<compile_context>
chip_gen: v7x
topology: tpu7x:2x2x1
jax: 0.10.0
libtpu: 0.0.40
codegen_flags: <defaults>
</compile_context>

<pallas_src>
import jax
import jax.numpy as jnp
from jax.experimental import pallas as pl
from jax.experimental.pallas import tpu as pltpu

_BLOCK_ROWS = 512    # max sublane extent per block
_BLOCK_COLS = 1024   # lane-dense width (multiple of 128)


def _custom_activation_kernel(wb_ref, x_ref, o_ref):
    # wb_ref lives in SMEM: wb_ref[0] = weight, wb_ref[1] = bias (scalars).
    w = wb_ref[0]
    b = wb_ref[1]
    y = x_ref[...] * w + b          # VPU affine (Linear(1,1))
    o_ref[...] = jnp.tanh(y) + y    # EUP tanh + VPU add (custom_activation)


def custom_activation_model(x, weight, bias):
    """Forward pass of CustomActivationModel.

    Args:
      x:      (N, 1) float32
      weight: (1, 1) float32  (nn.Linear.weight)
      bias:   (1,)   float32  (nn.Linear.bias)
    Returns:
      (N, 1) float32
    """
    n, f = x.shape
    assert f == 1, "Linear(1, 1) expects in_features == 1"
    total = n * f

    # ---- choose a lane-dense 2-D layout -------------------------------------
    cols = _BLOCK_COLS if total >= _BLOCK_COLS else 128
    rows = pl.cdiv(total, cols)
    if rows >= _BLOCK_ROWS:
        block_rows = _BLOCK_ROWS
    else:
        block_rows = ((rows + 7) // 8) * 8          # keep sublane multiple of 8
    rows_padded = pl.cdiv(rows, block_rows) * block_rows
    padded_total = rows_padded * cols
    num_blocks = rows_padded // block_rows

    # ---- reshape / pad into the slab (static shapes, cheap layout plumbing) --
    x_flat = x.reshape(-1)
    if padded_total != total:
        x_flat = jnp.pad(x_flat, (0, padded_total - total))
    x2d = x_flat.reshape(rows_padded, cols)

    # weight & bias packed as a tiny SMEM-resident scalar array.
    wb = jnp.concatenate(
        [weight.reshape(-1), bias.reshape(-1)]).astype(jnp.float32)

    out2d = pl.pallas_call(
        _custom_activation_kernel,
        out_shape=jax.ShapeDtypeStruct((rows_padded, cols), x.dtype),
        grid_spec=pltpu.PrefetchScalarGridSpec(
            num_scalar_prefetch=0,
            grid=(num_blocks,),
            in_specs=[
                pl.BlockSpec(memory_space=pltpu.MemorySpace.SMEM),   # wb (2,)
                pl.BlockSpec((block_rows, cols), lambda i: (i, 0)),  # x slab
            ],
            out_specs=pl.BlockSpec((block_rows, cols), lambda i: (i, 0)),
        ),
        compiler_params=pltpu.CompilerParams(
            dimension_semantics=("parallel",)),   # no reduction; shard on v7x
    )(wb, x2d)

    # ---- undo padding / restore (N, 1) --------------------------------------
    return out2d.reshape(-1)[:total].reshape(n, f)


def _reference(x, weight, bias):
    y = x @ weight.T + bias
    return jnp.tanh(y) + y


if __name__ == "__main__":
    key = jax.random.PRNGKey(0)
    kx, kw, kb, kx2 = jax.random.split(key, 4)

    # Deterministic parameter init (mimics nn.Linear's uniform(-1, 1) bound
    # for in_features=1).
    weight = jax.random.uniform(kw, (1, 1), minval=-1.0, maxval=1.0,
                                dtype=jnp.float32)
    bias = jax.random.uniform(kb, (1,), minval=-1.0, maxval=1.0,
                              dtype=jnp.float32)

    # Small shape consistent with Linear(1, 1): batch=8, features=1.
    x_small = jax.random.normal(kx, (8, 1), dtype=jnp.float32)
    out_small = jax.block_until_ready(
        custom_activation_model(x_small, weight, bias))
    ref_small = _reference(x_small, weight, bias)
    assert out_small.shape == (8, 1)
    assert jnp.allclose(out_small, ref_small, atol=1e-5, rtol=1e-5)

    # Larger batch to exercise the lane-dense slab + tiled grid path.
    x_big = jax.random.normal(kx2, (4096, 1), dtype=jnp.float32)
    out_big = jax.block_until_ready(
        custom_activation_model(x_big, weight, bias))
    ref_big = _reference(x_big, weight, bias)
    assert out_big.shape == (4096, 1)
    assert jnp.allclose(out_big, ref_big, atol=1e-5, rtol=1e-5)

    print("KERNEL_OK")
</pallas_src>

<mosaic_0001>
module attributes {stable_mosaic.version = 11 : i64} {
  func.func @_custom_activation_kernel(%arg0: i32, %arg1: memref<2xf32, #tpu.memory_space<smem>>, %arg2: memref<8x128xf32, #tpu.memory_space<vmem>>, %arg3: memref<8x128xf32, #tpu.memory_space<vmem>>) attributes {dimension_semantics = [#tpu.dimension_semantics<parallel>], iteration_bounds = array<i64: 1>, scalar_prefetch = 0 : i64, scratch_operands = 0 : i64, tpu.core_type = #tpu.core_type<tc>, window_params = [{transform_indices = @transform_0, window_bounds = array<i64: 2>}, {transform_indices = @transform_1, window_bounds = array<i64: 8, 128>}, {transform_indices = @transform_2, window_bounds = array<i64: 8, 128>}]} {
    %c0 = arith.constant 0 : index
    %0 = memref.load %arg1[%c0] : memref<2xf32, #tpu.memory_space<smem>>
    %c1 = arith.constant 1 : index
    %1 = memref.load %arg1[%c1] : memref<2xf32, #tpu.memory_space<smem>>
    %c0_0 = arith.constant 0 : index
    %c0_1 = arith.constant 0 : index
    %2 = vector.load %arg2[%c0_0, %c0_1] : memref<8x128xf32, #tpu.memory_space<vmem>>, vector<8x128xf32>
    %3 = vector.broadcast %0 : f32 to vector<8x128xf32>
    %4 = arith.mulf %2, %3 : vector<8x128xf32>
    %5 = vector.broadcast %1 : f32 to vector<8x128xf32>
    %6 = arith.addf %4, %5 : vector<8x128xf32>
    %7 = math.tanh %6 : vector<8x128xf32>
    %8 = arith.addf %7, %6 : vector<8x128xf32>
    %c0_2 = arith.constant 0 : index
    %c0_3 = arith.constant 0 : index
    %9 = vector.load %arg3[%c0_2, %c0_3] : memref<8x128xf32, #tpu.memory_space<vmem>>, vector<8x128xf32>
    tpu.vector_store %arg3[%c0_2, %c0_3], %8 {strides = array<i32>} : memref<8x128xf32, #tpu.memory_space<vmem>>, vector<8x128xf32>,
    return
  }
  func.func @transform_0(%arg0: i32) -> i32 {
    %c0_i32 = arith.constant 0 : i32
    %c0_i32_0 = arith.constant 0 : i32
    return %c0_i32 : i32
  }
  func.func @transform_1(%arg0: i32) -> (i32, i32) {
    %c0_i32 = arith.constant 0 : i32
    %c0_i32_0 = arith.constant 0 : i32
    return %arg0, %c0_i32 : i32, i32
  }
  func.func @transform_2(%arg0: i32) -> (i32, i32) {
    %c0_i32 = arith.constant 0 : i32
    %c0_i32_0 = arith.constant 0 : i32
    return %arg0, %c0_i32 : i32, i32
  }
}

</mosaic_0001>

<bundles_post_ra>
// kernel: tpu_custom_call.1
= control target key start
LH: loop header
LB: loop body
LE: loop exit
PB: predicated region body
PF: predicated region fallthrough
CT: control target
= control target key end

     0   :  { %7 = vsyncpa [#allocation5], 0  ;;  %s181_s0 = inlined_call_operand.hbm [shape: f32[2], index: 0, kind: input, shape index: {}]   ;;  %s182_s1 = inlined_call_operand.hbm [shape: f32[8,128], index: 1, kind: input, shape index: {}]   ;;  %s183_s2 = inlined_call_operand.hbm [shape: f32[8,128], index: 2, kind: output, shape index: {}]  }
   0x1   :  { %8 = vsyncpa [#allocation3], 0 }
   0x2   :  { %9 = vsyncpa [#allocation4], 0  ;;  %s67_s11 = scalar_lea.hbm %s181_s0, 16 }
   0x3   :  { %p68_p0 = scmp.ne.s32.totalorder %s181_s0, %s67_s11  ;;  %p71_p1 = scmp.lt.u32.totalorder %s67_s11, %s181_s0 }
   0x5   :  { %p73_p2 = pnand %p71_p1, %p68_p0 }
   0x7   :  { %76 = shalt.err (!%p73_p2)
}
   0x8   :  { %s127_s16 = smov [#allocation2]   ;;  %s128_s19 = smov [#allocation6]  }
   0x9   :  { %17 = dma.hbm_to_smem %s181_s0, 16, %s127_s16, [#allocation5]  }
   0xa   :  { %s24_s20 = sshll.u32 %s128_s19, 4  ;;  %s77_s23 = scalar_lea.hbm %s182_s1, 128  ;;  %s25_s20 = int_to_ptr.vmem [resolvable:$true] %s24_s20 }
   0xb   :  { %p78_p3 = scmp.ne.s32.totalorder %s182_s1, %s77_s23  ;;  %p81_p4 = scmp.lt.u32.totalorder %s77_s23, %s182_s1 }
   0xd   :  { %p83_p5 = pnand %p81_p4, %p78_p3 }
   0xf   :  { %86 = shalt.err (!%p83_p5)
}
  0x10   :  { %s87_s28 = scalar_lea.vmem %s25_s20, 128  ;;  %p92_p7 = scmp.lt.s32.totalorder %s25_s20, %s25_s20 }
  0x11   :  { %p88_p6 = scmp.ne.s32.totalorder %s25_s20, %s87_s28  ;;  %p93_p8 = scmp.lt.s32.totalorder %s87_s28, %s87_s28 }
  0x13   :  { %p94_p9 = por %p93_p8, %p92_p7 }
  0x15   :  { %p95_p10 = pnand %p94_p9, %p88_p6 }
  0x17   :  { %98 = shalt.err (!%p95_p10)
}
  0x18   :  { %27 = dma.hbm_to_vmem [thread:$0]  %s182_s1, 128, %s25_s20, [#allocation3]  }
  0x19   :  { %121 = dma.done.wait [#allocation5], 16  }
  0x1a   :  { %122 = vsyncadd [#allocation5], 4294967280 }
  0x1b   :  { %123 = dma.done.wait [#allocation3], 128  }
  0x1c   :  { %124 = vsyncadd [#allocation3], 4294967168 }
  0x1d   :  { %34 = sfence }
  0x1e   :  { %s35_s30 = sld [smem:[#allocation2]]  ;;  %s61_s3 = sld [smem:[#allocation2 + $0x1]]  ;;  %v37_v0 = vld [vmem:[#allocation6] sm:$0xff] }
  0x1f   :  { %s129_s4 = smov [#allocation7]  }
  0x20   :  { %s51_s5 = sshll.u32 %s129_s4, 4  ;;  %s52_s5 = int_to_ptr.vmem [resolvable:$true] %s51_s5 }
  0x21   :  { %s99_s1 = scalar_lea.vmem %s52_s5, 128  ;;  %p104_p12 = scmp.lt.s32.totalorder %s52_s5, %s52_s5 }
  0x22   :  { %p100_p11 = scmp.ne.s32.totalorder %s52_s5, %s99_s1  ;;  %p105_p13 = scmp.lt.s32.totalorder %s99_s1, %s99_s1 }
  0x24   :  { %v38_v1 = vstv %s35_s30  ;;  %v40_v2 = vstv %s61_s3  ;;  %p106_p0 = por %p105_p13, %p104_p12 }
  0x25   :  { %v39_v3 = vmul.f32 %v38_v1, %v37_v0 }
  0x26   :  { %p107_p1 = pnand %p106_p0, %p100_p11 }
  0x27   :  { %v41_v4 = vadd.f32 %v40_v2, %v39_v3 }
  0x29   :  { %65 = vtanh.f32 %v41_v4 }
  0x33   :  { %v66_v5 = vpop.eup %65 }
  0x34   :  { %v43_v6 = vadd.f32 %v66_v5, %v41_v4 }
  0x36   :  { %44 = vst [vmem:[#allocation7] sm:$0xff] %v43_v6 }
  0x37   :  { %110 = shalt.err (!%p107_p1)
}
  0x38   :  { %s111_s8 = scalar_lea.hbm %s183_s2, 128 }
  0x39   :  { %p112_p2 = scmp.ne.s32.totalorder %s183_s2, %s111_s8  ;;  %p115_p3 = scmp.lt.u32.totalorder %s111_s8, %s183_s2 }
  0x3b   :  { %p117_p4 = pnand %p115_p3, %p112_p2 }
  0x3d   :  { %120 = shalt.err (!%p117_p4)
}
  0x3e   :  { %54 = dma.vmem_to_hbm [thread:$0]  %s52_s5, 128, %s183_s2, [#allocation4]  }
  0x3f   :  { %125 = dma.done.wait [#allocation4], 128  }
  0x40   :  { %126 = vsyncadd [#allocation4], 4294967168 }
  0x41   :  { %58 = vsyncpa [#allocation3], 1 }
  0x42   :  { %59 = vsyncpa [#allocation4], 1 }
  0x43   :  { %60 = vsyncpa [#allocation5], 1 }

</bundles_post_ra>
